<compile_context>
chip_gen: v5e
topology: v5e:2x2
jax: 0.10.0
libtpu: 0.0.40
codegen_flags: <defaults>
</compile_context>

<pallas_src>
import jax
import jax.numpy as jnp
from jax.experimental import pallas as pl
from jax.experimental.pallas import tpu as pltpu


def _attention_softmax_kernel(x_ref, w_ref, o_ref):
    # x_ref: (N, D, B_tile)  gloss embeddings, batch on lanes (VMEM)
    # w_ref: (D, 1)          attention weight as a column (VMEM)
    # o_ref: (N, B_tile)     per-example softmax weights, lane-dense (VMEM)
    x = x_ref[...]                                       # (N, D, Bt) f32
    w = w_ref[...]                                       # (D, 1)     f32

    # Linear(D, 1) scores: VPU multiply + reduce over D (keep the MXU out of
    # this degenerate contraction).
    scores = jnp.sum(x * w[jnp.newaxis, :, :], axis=1)   # (N, Bt)

    # Numerically stable, exactly normalized softmax over the N (gloss) axis.
    m = jnp.max(scores, axis=0, keepdims=True)           # (1, Bt)
    e = jnp.exp(scores - m)                               # (N, Bt)
    denom = jnp.sum(e, axis=0, keepdims=True)             # (1, Bt)
    o_ref[...] = e / denom


def sentiment_analyzer_batched(gloss_embeddings, weight, bias=None, *, batch_tile=128):
    """Batched SentimentAnalyzer.forward.

    gloss_embeddings: (B, N, D) float32
    weight:           (1, D)    float32   (nn.Linear(D, 1).weight)
    bias:             (1,)      float32   (accepted; softmax-invariant, unused)
    returns:          (B, N, 1) float32 softmax weights over the N axis.
    """
    del bias  # softmax over N is invariant to the constant Linear bias.
    B, N, D = gloss_embeddings.shape
    if B % batch_tile != 0:
        # Whole batch in a single block; VMEM is not a constraint at this size.
        batch_tile = B
    grid = (B // batch_tile,)

    # Batch on lanes: (B, N, D) -> (N, D, B).  Wrapper-side layout plumbing so
    # the kernel's output block is a full (N, 128) slab of lanes.
    x_t = jnp.transpose(gloss_embeddings, (1, 2, 0))
    w_col = weight.reshape(D, 1)

    out_nb = pl.pallas_call(
        _attention_softmax_kernel,
        out_shape=jax.ShapeDtypeStruct((N, B), jnp.float32),
        grid=grid,
        in_specs=[
            pl.BlockSpec((N, D, batch_tile), lambda b: (0, 0, b)),
            pl.BlockSpec((D, 1), lambda b: (0, 0)),
        ],
        out_specs=pl.BlockSpec((N, batch_tile), lambda b: (0, b)),
        compiler_params=pltpu.CompilerParams(
            dimension_semantics=("parallel",)),
    )(x_t, w_col)

    # (N, B) -> (B, N, 1): the PyTorch per-example output layout.
    return jnp.transpose(out_nb, (1, 0))[..., jnp.newaxis]


def sentiment_analyzer_forward(context_embedding, gloss_embeddings, weight, bias):
    """Single-example SentimentAnalyzer.forward (matches the PyTorch module).

    context_embedding: (D,) — unused by the reference forward.
    gloss_embeddings:  (N, D) float32
    weight: (1, D), bias: (1,) — nn.Linear(D, 1) parameters.
    returns: (N, 1) float32 softmax weights over the N axis.

    Prefer sentiment_analyzer_batched: a standalone per-example call is
    dispatch/DMA-overhead bound on every TPU generation.
    """
    del context_embedding  # unused by the reference forward pass
    out = sentiment_analyzer_batched(gloss_embeddings[jnp.newaxis], weight, bias)
    return out[0]


if __name__ == "__main__":
    embedding_dim = 32   # D
    num_glosses = 8      # N
    batch = 256          # B examples batched into one pallas_call (grid=(2,))

    key = jax.random.PRNGKey(0)
    k_ctx, k_gloss, k_w, k_b = jax.random.split(key, 4)

    # Deterministic synthetic parameters (shapes from nn.Linear(embedding_dim, 1)).
    weight = jax.random.normal(k_w, (1, embedding_dim), dtype=jnp.float32) * 0.1
    bias = jax.random.normal(k_b, (1,), dtype=jnp.float32) * 0.1

    context_embedding = jax.random.normal(k_ctx, (embedding_dim,), dtype=jnp.float32)
    gloss_batch = jax.random.normal(
        k_gloss, (batch, num_glosses, embedding_dim), dtype=jnp.float32
    )

    # Batched path: one pallas_call, parallel grid over 128-example tiles.
    weights_batch = sentiment_analyzer_batched(gloss_batch, weight, bias)
    weights_batch = jax.block_until_ready(weights_batch)

    # Per-example path with the module-equivalent signature.
    weights_single = sentiment_analyzer_forward(
        context_embedding, gloss_batch[0], weight, bias
    )
    weights_single = jax.block_until_ready(weights_single)

    # Plain-JAX reference: Linear (with bias) + softmax over the gloss axis.
    scores_ref = jnp.einsum("bnd,d->bn", gloss_batch, weight[0]) + bias[0]
    ref = jax.nn.softmax(scores_ref, axis=-1)[..., jnp.newaxis]        # (B, N, 1)

    assert weights_batch.shape == (batch, num_glosses, 1)
    assert weights_single.shape == (num_glosses, 1)
    assert jnp.allclose(weights_batch, ref, atol=1e-5, rtol=1e-5)
    assert jnp.allclose(weights_single, ref[0], atol=1e-5, rtol=1e-5)
    assert jnp.allclose(jnp.sum(weights_batch, axis=1), 1.0, atol=1e-5)

    print("KERNEL_OK")
</pallas_src>

<mosaic_0001>
module attributes {stable_mosaic.version = 11 : i64} {
  func.func @_attention_softmax_kernel(%arg0: i32, %arg1: memref<8x32x128xf32, #tpu.memory_space<vmem>>, %arg2: memref<32x1xf32, #tpu.memory_space<vmem>>, %arg3: memref<8x128xf32, #tpu.memory_space<vmem>>) attributes {dimension_semantics = [#tpu.dimension_semantics<parallel>], iteration_bounds = array<i64: 2>, scalar_prefetch = 0 : i64, scratch_operands = 0 : i64, tpu.core_type = #tpu.core_type<tc>, window_params = [{transform_indices = @transform_0, window_bounds = array<i64: 8, 32, 128>}, {pipeline_mode = #tpu.pipeline_mode<synchronous>, transform_indices = @transform_1, window_bounds = array<i64: 32, 1>}, {transform_indices = @transform_2, window_bounds = array<i64: 8, 128>}]} {
    %c0 = arith.constant 0 : index
    %c0_0 = arith.constant 0 : index
    %c0_1 = arith.constant 0 : index
    %0 = vector.load %arg1[%c0, %c0_0, %c0_1] : memref<8x32x128xf32, #tpu.memory_space<vmem>>, vector<8x32x128xf32>
    %c0_2 = arith.constant 0 : index
    %c0_3 = arith.constant 0 : index
    %1 = vector.load %arg2[%c0_2, %c0_3] : memref<32x1xf32, #tpu.memory_space<vmem>>, vector<32x1xf32>
    %2 = vector.shape_cast %1 : vector<32x1xf32> to vector<1x32x1xf32>
    %3 = vector.broadcast %2 : vector<1x32x1xf32> to vector<8x32x128xf32>
    %4 = arith.mulf %0, %3 : vector<8x32x128xf32>
    %cst = arith.constant dense<0.000000e+00> : vector<8x128xf32>
    %5 = vector.multi_reduction <add>, %4, %cst [1] : vector<8x32x128xf32> to vector<8x128xf32>
    %cst_4 = arith.constant dense<0xFF800000> : vector<128xf32>
    %6 = vector.multi_reduction <maximumf>, %5, %cst_4 [0] : vector<8x128xf32> to vector<128xf32>
    %7 = vector.shape_cast %6 : vector<128xf32> to vector<1x128xf32>
    %8 = vector.broadcast %7 : vector<1x128xf32> to vector<8x128xf32>
    %9 = arith.subf %5, %8 : vector<8x128xf32>
    %10 = math.exp %9 : vector<8x128xf32>
    %cst_5 = arith.constant dense<0.000000e+00> : vector<128xf32>
    %11 = vector.multi_reduction <add>, %10, %cst_5 [0] : vector<8x128xf32> to vector<128xf32>
    %12 = vector.shape_cast %11 : vector<128xf32> to vector<1x128xf32>
    %13 = vector.broadcast %12 : vector<1x128xf32> to vector<8x128xf32>
    %14 = arith.divf %10, %13 : vector<8x128xf32>
    %c0_6 = arith.constant 0 : index
    %c0_7 = arith.constant 0 : index
    %15 = vector.load %arg3[%c0_6, %c0_7] : memref<8x128xf32, #tpu.memory_space<vmem>>, vector<8x128xf32>
    tpu.vector_store %arg3[%c0_6, %c0_7], %14 {strides = array<i32>} : memref<8x128xf32, #tpu.memory_space<vmem>>, vector<8x128xf32>,
    return
  }
  func.func @transform_0(%arg0: i32) -> (i32, i32, i32) {
    %c0_i32 = arith.constant 0 : i32
    %c0_i32_0 = arith.constant 0 : i32
    %c0_i32_1 = arith.constant 0 : i32
    return %c0_i32, %c0_i32_0, %arg0 : i32, i32, i32
  }
  func.func @transform_1(%arg0: i32) -> (i32, i32) {
    %c0_i32 = arith.constant 0 : i32
    %c0_i32_0 = arith.constant 0 : i32
    %c0_i32_1 = arith.constant 0 : i32
    return %c0_i32, %c0_i32_0 : i32, i32
  }
  func.func @transform_2(%arg0: i32) -> (i32, i32) {
    %c0_i32 = arith.constant 0 : i32
    %c0_i32_0 = arith.constant 0 : i32
    return %c0_i32, %arg0 : i32, i32
  }
}

</mosaic_0001>

<bundles_post_ra>
// kernel: tpu_custom_call.1
= control target key start
LH: loop header
LB: loop body
LE: loop exit
PB: predicated region body
PF: predicated region fallthrough
CT: control target
= control target key end

     0   :  { %7 = vsyncpa [#allocation3], 0  ;;  %s908_s0 = inlined_call_operand.hbm [shape: f32[8,32,256], index: 0, kind: input, shape index: {}]   ;;  %s909_s1 = inlined_call_operand.vmem [shape: f32[32,1], index: 1, kind: input, shape index: {}]   ;;  %s910_s2 = inlined_call_operand.hbm [shape: f32[8,256], index: 2, kind: output, shape index: {}]  }
   0x1   :  { %9 = vsyncpa [#allocation3 + $0x1], 0 }
   0x2   :  { %10 = vsyncpa [#allocation4], 0 }
   0x3   :  { %12 = vsyncpa [#allocation4 + $0x1], 0  ;;  %s722_s9 = smov 0   ;;  %s724_s10 = smov 0  }
   0x4   :  { %s726_s11 = smov 0   ;;  %s728_s12 = smov 0  }
   0x5 LB: > { %s743_s13 = sadd.s32 4294967295, %s701_s12   ;;  %s523_s14 = sadd.s32 4294967294, %s701_s12   ;;  %s701_s12 = sphi %s728_s12, %s919_s12   ;;  %s697_s11 = sphi %s726_s11, %s918_s11   ;;  %s693_s10 = sphi %s724_s10, %s917_s10   ;;  %s689_s9 = sphi %s722_s9, %s916_s9  }
   0x6   : > { %s747_s15 = sadd.s32 1, %s701_s12   ;;  %s25_s16 = sadd.s32 1, %s697_s11 }
   0x7   : > { %s22_s17 = ssub.s32 %s701_s12, %s747_s15  ;;  %p32_p0 = scmp.ne.s32.totalorder %s697_s11, %s693_s10 }
   0x8   : > { %p23_p1 = scmp.eq.s32.totalorder %s22_s17, 0  ;;  %p33_p2 = scmp.eq.s32.totalorder %s701_s12, 0 }
   0x9   : > { %p38_p3 = scmp.ne.s32.totalorder %s693_s10, %s689_s9  ;;  %p39_p4 = scmp.eq.s32.totalorder %s743_s13, 0 }
   0xa   : > { %s759_s18 = scalar_select %p23_p1, %s697_s11, %s25_s16  }
   0xb   : > { %p761_p5 = por %p33_p2, %p32_p0  ;;  %p765_p6 = por %p39_p4, %p38_p3 }
   0xc   : > { %p83_p7 = scmp.eq.s32.totalorder %s743_s13, 1  ;;  %p89_p8 = scmp.eq.s32.totalorder %s523_s14, 1 }
   0xd   : > { %p525_p9 = scmp.ge.s32.totalorder %s701_s12, 2  ;;  %p547_p10 = scmp.lt.s32.totalorder %s701_s12, 2 }
   0xe   : > { %p772_p11 = por %p83_p7, %p32_p0  ;;  %p776_p12 = por %p89_p8, %p38_p3 }
   0xf   : > { %s112_s23 = sand.u32 1, %s697_s11   ;;  %s527_s24 = sshll.u32 %s701_s12, 3 }
  0x10   : > { %s526_s25 = sshll.u32 %s112_s23, 8  ;;  %s120_s28 = scalar_lea.hbm %s908_s0, %s527_s24 }
  0x11   : > { %s121_s29 = sshll.u32 %s120_s28, 4  ;;  %s116_s30 = scalar_lea.vmem [#allocation2], %s526_s25  ;;  %s122_s29 = int_to_ptr.hbm [resolvable:$true] %s121_s29 }
  0x12   : > { %s123_s3 = sshll.u32 %s116_s30, 4  ;;  %p787_p13 = pnand %p547_p10, %p761_p5  ;;  %s124_s3 = int_to_ptr.vmem [resolvable:$true] %s123_s3 }
  0x13   : > { %p528_p0 = scmp.ge.s32.totalorder %s701_s12, 1  ;;  %s113_s5 = scalar_lea.sflag [#allocation3], %s112_s23 }
  0x14   : > { %s605_s6 = sshra.s32 %s122_s29, 4  ;;  %p609_p2 = pneg %p787_p13  ;;  %s606_s6 = int_to_ptr.hbm [resolvable:$true] %s605_s6 }
  0x15   : > { %s607_s7 = scalar_lea.hbm %s606_s6, 256  ;;  %s612_s16 = scalar_lea.hbm %s908_s0, 512 }
  0x16   : > { %p608_p1 = scmp.ne.s32.totalorder %s606_s6, %s607_s7  ;;  %p613_p5 = scmp.lt.s32.totalorder %s606_s6, %s908_s0 }
  0x17   : > { %p614_p7 = scmp.lt.s32.totalorder %s612_s16, %s607_s7 }
  0x18   : > { %p610_p3 = pnand %p609_p2, %p608_p1 }
  0x19   : > { %p615_p8 = por %p614_p7, %p613_p5 }
  0x1a   : > { %p611_p4 = pneg %p610_p3 }
  0x1c   : > { %p616_p10 = pnand %p615_p8, %p611_p4 }
  0x1e   : > { %619 = shalt.err (!%p616_p10)
}
  0x1f   : > { %s703_s23 = smov 256   ;;  %s704_s24 = smov 128  }
  0x20   : > { %s705_s25 = smov 8   ;;  %p131_p1 = scmp.lt.s32.totalorder %s701_s12, 3 }
  0x21   : > { %542 = dma.hbm_to_vmem [thread:$0]  (!%p787_p13), %s122_s29, 4096, %s124_s3, %s113_s5, %s703_s23, %s704_s24, %s705_s25  }
  0x22   : > { %p132_p2 = pnand %p528_p0, %p131_p1 }
  0x23   : > { %s806_s26 = sand.u32 (!%p132_p2), 1, %s693_s10  }
  0x24   : > { %135 = sbr.rel (%p132_p2) target bundleno = 262 (0x106), region = 28  ;;  %s529_s27 = sshll.u32 (!%p132_p2), %s806_s26, 8 }
  0x25   : > { %s138_s28 = scalar_lea.sflag (!%p132_p2), [#allocation3], %s806_s26  ;;  %s810_s30 = scalar_lea.vmem (!%p132_p2), [#allocation2], %s529_s27 }
  0x29   : > { %680 = dma.done.wait (%p765_p6), %s138_s28, 4096  }
  0x2a   : > { %682 = vsyncadd (%p765_p6), %s138_s28, 4294963200  ;;  %v706_v0 = vmov 0   ;;  %v197_v1 = vld [vmem:[%s909_s1 + $0x10] sm:$0xff]  ;;  %v195_v2 = vld [vmem:[%s909_s1] sm:$0xff]  ;;  %vm363_vm0 = vcmask 1041409   ;;  %vm366_vm1 = vcmask 1042434  }
  0x2b   : > { %586 = vset.pattern.permute.xlu1 %v706_v0  ;;  %585 = vset.pattern.permute.xlu0 %v706_v0  ;;  %v198_v3 = vld [vmem:[%s909_s1 + $0x18] sm:$0xff]  ;;  %v196_v4 = vld [vmem:[%s909_s1 + $0x8] sm:$0xff]  ;;  %v165_v6 = vld [vmem:[%s810_s30 + $0x10] sm:$0xff]  ;;  %vm369_vm2 = vcmask 1043459   ;;  %vm372_vm3 = vcmask 1044484   ;;  %vm375_vm4 = vcmask 1045509  }
  0x2c   : > { %211 = vperm.xlu1 %586, %v197_v1   ;;  %201 = vperm.xlu0 %585, %v195_v2   ;;  %v169_v7 = vld [vmem:[%s810_s30 + $0x30] sm:$0xff]  ;;  %v163_v15 = vld [vmem:[%s810_s30] sm:$0xff]  ;;  %v166_v21 = vld [vmem:[%s810_s30 + $0x18] sm:$0xff]  ;;  %vm378_vm5 = vcmask 1046534   ;;  %vm381_vm6 = vcmask 1047559   ;;  %s530_s14 = sshll.u32 %s806_s26, 3 }
  0x2d   : > { %v173_v8 = vld [vmem:[%s810_s30 + $0x50] sm:$0xff]  ;;  %v167_v16 = vld [vmem:[%s810_s30 + $0x20] sm:$0xff]  ;;  %v170_v28 = vld [vmem:[%s810_s30 + $0x38] sm:$0xff]  ;;  %s532_s16 = sshll.u32 %s743_s13, 3  ;;  %s162_s13 = scalar_lea.vmem [#allocation5], %s530_s14 }
  0x2e   : > { %v177_v9 = vld [vmem:[%s810_s30 + $0x70] sm:$0xff]  ;;  %v171_v17 = vld [vmem:[%s810_s30 + $0x40] sm:$0xff]  ;;  %v174_v29 = vld [vmem:[%s810_s30 + $0x58] sm:$0xff]  ;;  %s448_s23 = scalar_lea.hbm %s910_s2, %s532_s16  ;;  %s450_s24 = sshll.u32 %s162_s13, 4  ;;  %s451_s24 = int_to_ptr.vmem [resolvable:$true] %s450_s24 }
  0x2f   : > { %v181_v11 = vld [vmem:[%s810_s30 + $0x90] sm:$0xff]  ;;  %v175_v18 = vld [vmem:[%s810_s30 + $0x60] sm:$0xff]  ;;  %v178_v30 = vld [vmem:[%s810_s30 + $0x78] sm:$0xff]  ;;  %s452_s25 = sshll.u32 %s448_s23, 4  ;;  %s438_s27 = scalar_lea.sflag [#allocation4], %s806_s26  ;;  %s453_s25 = int_to_ptr.hbm [resolvable:$true] %s452_s25 }
  0x30   : > { %v185_v12 = vld [vmem:[%s810_s30 + $0xb0] sm:$0xff]  ;;  %v179_v19 = vld [vmem:[%s810_s30 + $0x80] sm:$0xff]  ;;  %v182_v35 = vld [vmem:[%s810_s30 + $0x98] sm:$0xff]  ;;  %s649_s28 = sshra.s32 %s453_s25, 4  ;;  %s655_s4 = scalar_lea.hbm %s910_s2, 16  ;;  %s650_s28 = int_to_ptr.hbm [resolvable:$true] %s649_s28 }
  0x31   : > { %v189_v13 = vld [vmem:[%s810_s30 + $0xd0] sm:$0xff]  ;;  %v183_v20 = vld [vmem:[%s810_s30 + $0xa0] sm:$0xff]  ;;  %v186_v36 = vld [vmem:[%s810_s30 + $0xb8] sm:$0xff]  ;;  %p656_p3 = scmp.lt.s32.totalorder %s650_s28, %s910_s2 }
  0x32   : > { %v193_v14 = vld [vmem:[%s810_s30 + $0xf0] sm:$0xff]  ;;  %v187_v22 = vld [vmem:[%s810_s30 + $0xc0] sm:$0xff]  ;;  %v190_v37 = vld [vmem:[%s810_s30 + $0xd8] sm:$0xff] }
  0x33   : > { %v191_v23 = vld [vmem:[%s810_s30 + $0xe0] sm:$0xff]  ;;  %v194_v38 = vld [vmem:[%s810_s30 + $0xf8] sm:$0xff]  ;;  %v164_v39 = vld [vmem:[%s810_s30 + $0x8] sm:$0xff] }
  0x34   : > { %216 = vperm.xlu1 %586, %v198_v3   ;;  %206 = vperm.xlu0 %585, %v196_v4   ;;  %v168_v40 = vld [vmem:[%s810_s30 + $0x28] sm:$0xff] }
  0x35   : > { %v172_v47 = vld [vmem:[%s810_s30 + $0x48] sm:$0xff] }
  0x36   : > { %v176_v48 = vld [vmem:[%s810_s30 + $0x68] sm:$0xff] }
  0x37   : > { %v180_v49 = vld [vmem:[%s810_s30 + $0x88] sm:$0xff] }
  0x38   : > { %v184_v58 = vld [vmem:[%s810_s30 + $0xa8] sm:$0xff] }
  0x39   : > { %v188_v59 = vld [vmem:[%s810_s30 + $0xc8] sm:$0xff] }
  0x3a   : > { %v192_v60 = vld [vmem:[%s810_s30 + $0xe8] sm:$0xff]  ;;  %s651_s30 = scalar_lea.hbm %s650_s28, 8 }
  0x3b   : > { %p652_p6 = scmp.ne.s32.totalorder %s650_s28, %s651_s30  ;;  %p657_p4 = scmp.lt.s32.totalorder %s655_s4, %s651_s30 }
  0x3d   : > { %p653_p13 = pnand %p652_p6, %p772_p11  ;;  %p658_p5 = por %p657_p4, %p656_p3 }
  0x3f   : > { %p654_p0 = pneg %p653_p13 }
  0x41   : > { %p659_p7 = pnand %p658_p5, %p654_p0 }
  0x9e   : > { %v212_v5 = vpop.permute.xlu1 %211  ;;  %v202_v10 = vpop.permute.xlu0 %201 }
  0x9f   : > { %v221_v24 = vmul.f32 %v212_v5, %v165_v6  ;;  %v225_v25 = vmul.f32 %v212_v5, %v169_v7  ;;  %v229_v26 = vmul.f32 %v212_v5, %v173_v8  ;;  %v233_v27 = vmul.f32 %v212_v5, %v177_v9 }
  0xa0   : > { %v237_v31 = vmul.f32 %v212_v5, %v181_v11  ;;  %v241_v32 = vmul.f32 %v212_v5, %v185_v12  ;;  %v245_v33 = vmul.f32 %v212_v5, %v189_v13  ;;  %v249_v34 = vmul.f32 %v212_v5, %v193_v14 }
  0xa1   : > { %v219_v41 = vmul.f32 %v202_v10, %v163_v15  ;;  %v223_v42 = vmul.f32 %v202_v10, %v167_v16  ;;  %v227_v43 = vmul.f32 %v202_v10, %v171_v17  ;;  %v231_v44 = vmul.f32 %v202_v10, %v175_v18 }
  0xa2   : > { %v235_v50 = vmul.f32 %v202_v10, %v179_v19  ;;  %v239_v51 = vmul.f32 %v202_v10, %v183_v20  ;;  %v243_v52 = vmul.f32 %v202_v10, %v187_v22  ;;  %v247_v53 = vmul.f32 %v202_v10, %v191_v23 }
  0xa6   : > { %v217_v45 = vpop.permute.xlu1 %216  ;;  %v207_v46 = vpop.permute.xlu0 %206 }
  0xa7   : > { %v222_v54 = vmul.f32 %v217_v45, %v166_v21  ;;  %v226_v55 = vmul.f32 %v217_v45, %v170_v28  ;;  %v230_v56 = vmul.f32 %v217_v45, %v174_v29  ;;  %v234_v57 = vmul.f32 %v217_v45, %v178_v30 }
  0xa8   : > { %v238_v61 = vmul.f32 %v217_v45, %v182_v35  ;;  %v242_v62 = vmul.f32 %v217_v45, %v186_v36  ;;  %v246_v63 = vmul.f32 %v217_v45, %v190_v37  ;;  %v250_v0 = vmul.f32 %v217_v45, %v194_v38 }
  0xa9   : > { %v220_v1 = vmul.f32 %v207_v46, %v164_v39  ;;  %v224_v2 = vmul.f32 %v207_v46, %v168_v40  ;;  %v228_v3 = vmul.f32 %v207_v46, %v172_v47  ;;  %v232_v4 = vmul.f32 %v207_v46, %v176_v48 }
  0xaa   : > { %v236_v5 = vmul.f32 %v207_v46, %v180_v49  ;;  %v240_v6 = vmul.f32 %v207_v46, %v184_v58  ;;  %v244_v7 = vmul.f32 %v207_v46, %v188_v59  ;;  %v248_v8 = vmul.f32 %v207_v46, %v192_v60 }
  0xab   : > { %v251_v9 = vadd.f32 %v220_v1, %v219_v41  ;;  %v260_v10 = vadd.f32 %v224_v2, %v223_v42  ;;  %v269_v11 = vadd.f32 %v228_v3, %v227_v43  ;;  %v278_v12 = vadd.f32 %v232_v4, %v231_v44 }
  0xac   : > { %v287_v13 = vadd.f32 %v236_v5, %v235_v50  ;;  %v296_v14 = vadd.f32 %v240_v6, %v239_v51  ;;  %v305_v15 = vadd.f32 %v244_v7, %v243_v52  ;;  %v314_v16 = vadd.f32 %v248_v8, %v247_v53 }
  0xad   : > { %v252_v17 = vadd.f32 %v251_v9, %v221_v24  ;;  %v261_v18 = vadd.f32 %v260_v10, %v225_v25  ;;  %v270_v19 = vadd.f32 %v269_v11, %v229_v26  ;;  %v279_v20 = vadd.f32 %v278_v12, %v233_v27 }
  0xae   : > { %v288_v21 = vadd.f32 %v287_v13, %v237_v31  ;;  %v297_v22 = vadd.f32 %v296_v14, %v241_v32  ;;  %v306_v23 = vadd.f32 %v305_v15, %v245_v33  ;;  %v315_v28 = vadd.f32 %v314_v16, %v249_v34 }
  0xaf   : > { %v253_v29 = vadd.f32 %v252_v17, %v222_v54  ;;  %v262_v30 = vadd.f32 %v261_v18, %v226_v55  ;;  %v271_v35 = vadd.f32 %v270_v19, %v230_v56  ;;  %v280_v36 = vadd.f32 %v279_v20, %v234_v57 }
  0xb0   : > { %v289_v37 = vadd.f32 %v288_v21, %v238_v61  ;;  %v298_v38 = vadd.f32 %v297_v22, %v242_v62  ;;  %v307_v39 = vadd.f32 %v306_v23, %v246_v63  ;;  %v316_v40 = vadd.f32 %v315_v28, %v250_v0 }
  0xb1   : > { %v254_v41 = vrot.slane %v253_v29, 4  ;;  %v263_v42 = vrot.slane %v262_v30, 4  ;;  %v272_v43 = vrot.slane %v271_v35, 4  ;;  %v281_v44 = vrot.slane %v280_v36, 4 }
  0xb2   : > { %v290_v24 = vrot.slane %v289_v37, 4  ;;  %v299_v25 = vrot.slane %v298_v38, 4  ;;  %v308_v26 = vrot.slane %v307_v39, 4  ;;  %v317_v27 = vrot.slane %v316_v40, 4 }
  0xb3   : > { %v255_v31 = vadd.f32 %v254_v41, %v253_v29  ;;  %v264_v32 = vadd.f32 %v263_v42, %v262_v30  ;;  %v273_v33 = vadd.f32 %v272_v43, %v271_v35  ;;  %v282_v34 = vadd.f32 %v281_v44, %v280_v36 }
  0xb4   : > { %v291_v45 = vadd.f32 %v290_v24, %v289_v37  ;;  %v300_v46 = vadd.f32 %v299_v25, %v298_v38  ;;  %v309_v47 = vadd.f32 %v308_v26, %v307_v39  ;;  %v318_v48 = vadd.f32 %v317_v27, %v316_v40 }
  0xb5   : > { %v256_v49 = vrot.slane %v255_v31, 2  ;;  %v265_v50 = vrot.slane %v264_v32, 2  ;;  %v274_v51 = vrot.slane %v273_v33, 2  ;;  %v283_v52 = vrot.slane %v282_v34, 2 }
  0xb6   : > { %v292_v53 = vrot.slane %v291_v45, 2  ;;  %v301_v54 = vrot.slane %v300_v46, 2  ;;  %v310_v55 = vrot.slane %v309_v47, 2  ;;  %v319_v56 = vrot.slane %v318_v48, 2 }
  0xb7   : > { %v257_v57 = vadd.f32 %v256_v49, %v255_v31  ;;  %v266_v58 = vadd.f32 %v265_v50, %v264_v32  ;;  %v275_v59 = vadd.f32 %v274_v51, %v273_v33  ;;  %v284_v60 = vadd.f32 %v283_v52, %v282_v34 }
  0xb8   : > { %v293_v61 = vadd.f32 %v292_v53, %v291_v45  ;;  %v302_v62 = vadd.f32 %v301_v54, %v300_v46  ;;  %v311_v63 = vadd.f32 %v310_v55, %v309_v47  ;;  %v320_v0 = vadd.f32 %v319_v56, %v318_v48 }
  0xb9   : > { %v258_v1 = vrot.slane %v257_v57, 1  ;;  %v267_v2 = vrot.slane %v266_v58, 1  ;;  %v276_v3 = vrot.slane %v275_v59, 1  ;;  %v285_v4 = vrot.slane %v284_v60, 1 }
  0xba   : > { %v294_v5 = vrot.slane %v293_v61, 1  ;;  %v303_v6 = vrot.slane %v302_v62, 1  ;;  %v312_v7 = vrot.slane %v311_v63, 1  ;;  %v321_v8 = vrot.slane %v320_v0, 1 }
  0xbb   : > { %v259_v9 = vadd.f32 %v258_v1, %v257_v57  ;;  %v268_v10 = vadd.f32 %v267_v2, %v266_v58  ;;  %v277_v11 = vadd.f32 %v276_v3, %v275_v59  ;;  %v286_v12 = vadd.f32 %v285_v4, %v284_v60 }
  0xbc   : > { %v295_v13 = vadd.f32 %v294_v5, %v293_v61  ;;  %v304_v14 = vadd.f32 %v303_v6, %v302_v62  ;;  %v313_v15 = vadd.f32 %v312_v7, %v311_v63  ;;  %v322_v16 = vadd.f32 %v321_v8, %v320_v0 }
  0xbe   : > { %v323_v17 = vmax.f32 %v259_v9, %v295_v13  ;;  %v324_v18 = vmax.f32 %v268_v10, %v304_v14  ;;  %v325_v19 = vmax.f32 %v277_v11, %v313_v15  ;;  %v326_v20 = vmax.f32 %v286_v12, %v322_v16 }
  0xc0   : > { %v327_v21 = vmax.f32 %v323_v17, %v324_v18  ;;  %v328_v22 = vmax.f32 %v325_v19, %v326_v20 }
  0xc2   : > { %v329_v23 = vmax.f32 %v327_v21, %v328_v22 }
  0xc4   : > { %v330_v28 = vsub.f32 %v259_v9, %v329_v23  ;;  %v331_v29 = vsub.f32 %v268_v10, %v329_v23  ;;  %v332_v30 = vsub.f32 %v277_v11, %v329_v23  ;;  %v333_v35 = vsub.f32 %v286_v12, %v329_v23 }
  0xc5   : > { %v334_v36 = vsub.f32 %v295_v13, %v329_v23  ;;  %v335_v37 = vsub.f32 %v304_v14, %v329_v23  ;;  %v336_v38 = vsub.f32 %v313_v15, %v329_v23  ;;  %v337_v42 = vsub.f32 %v322_v16, %v329_v23 }
  0xc6   : > { %v338_v39 = vmul.f32 1.442695, %v330_v28  ;;  %v340_v40 = vmul.f32 1.442695, %v331_v29  ;;  %v342_v41 = vmul.f32 1.442695, %v332_v30 }
  0xc7   : > { %v344_v43 = vmul.f32 1.442695, %v333_v35  ;;  %v346_v44 = vmul.f32 1.442695, %v334_v36  ;;  %v348_v24 = vmul.f32 1.442695, %v335_v37 }
  0xc8   : > { %587 = vpow2.f32 %v338_v39  ;;  %v350_v25 = vmul.f32 1.442695, %v336_v38  ;;  %v352_v26 = vmul.f32 1.442695, %v337_v42 }
  0xc9   : > { %589 = vpow2.f32 %v340_v40 }
  0xca   : > { %591 = vpow2.f32 %v342_v41 }
  0xcb   : > { %593 = vpow2.f32 %v344_v43 }
  0xcc   : > { %595 = vpow2.f32 %v346_v44 }
  0xcd   : > { %597 = vpow2.f32 %v348_v24 }
  0xce   : > { %v588_v27 = vpop.eup %587  ;;  %599 = vpow2.f32 %v350_v25 }
  0xcf   : > { %v590_v31 = vpop.eup %589  ;;  %601 = vpow2.f32 %v352_v26 }
  0xd0   : > { %v592_v32 = vpop.eup %591  ;;  %v362_v33 = vrot.slane %v590_v31, 7 }
  0xd1   : > { %v594_v34 = vpop.eup %593  ;;  %v365_v45 = vrot.slane %v592_v32, 6 }
  0xd2   : > { %v596_v46 = vpop.eup %595  ;;  %v364_v47 = vsel %vm363_vm0, %v362_v33, %v588_v27  ;;  %v368_v48 = vrot.slane %v594_v34, 5 }
  0xd3   : > { %v598_v49 = vpop.eup %597  ;;  %v367_v50 = vsel %vm366_vm1, %v365_v45, %v364_v47  ;;  %v371_v51 = vrot.slane %v596_v46, 4 }
  0xd4   : > { %v600_v52 = vpop.eup %599  ;;  %v370_v53 = vsel %vm369_vm2, %v368_v48, %v367_v50  ;;  %v374_v54 = vrot.slane %v598_v49, 3 }
  0xd5   : > { %v602_v55 = vpop.eup %601  ;;  %v373_v56 = vsel %vm372_vm3, %v371_v51, %v370_v53  ;;  %v377_v57 = vrot.slane %v600_v52, 2 }
  0xd6   : > { %v376_v58 = vsel %vm375_vm4, %v374_v54, %v373_v56  ;;  %v380_v59 = vrot.slane %v602_v55, 1 }
  0xd7   : > { %v379_v60 = vsel %vm378_vm5, %v377_v57, %v376_v58 }
  0xd8   : > { %v382_v61 = vsel %vm381_vm6, %v380_v59, %v379_v60 }
  0xd9   : > { %v384_v62 = vrot.slane %v382_v61, 4 }
  0xdb   : > { %v385_v63 = vadd.f32 %v384_v62, %v382_v61 }
  0xdd   : > { %v386_v0 = vrot.slane %v385_v63, 2 }
  0xdf   : > { %v387_v1 = vadd.f32 %v386_v0, %v385_v63 }
  0xe1   : > { %v388_v2 = vrot.slane %v387_v1, 1 }
  0xe3   : > { %v389_v3 = vadd.f32 %v388_v2, %v387_v1 }
  0xe5   : > { %v390_v4 = vperm.slane %v389_v3, 0 }
  0xe7   : > { %603 = vrcp.f32 %v390_v4  ;;  %v402_v8 = vand.u32 2147483648, %v390_v4  ;;  %v400_v10 = vand.u32 2147483647, %v390_v4  ;;  %vm396_vm8 = vweird.f32 %v390_v4 }
  0xe9   : > { %v403_v12 = vor.u32 1.1754944e-38, %v402_v8  ;;  %vm401_vm10 = vcmp.eq.f32.partialorder %v400_v10, 8.507059e+37 }
  0xed   : > { %v604_v5 = vpop.eup %603 }
  0xee   : > { %v392_v6 = vmul.f32 %v604_v5, %v390_v4  ;;  %vm397_vm7 = vweird.f32 %v604_v5 }
  0xef   : > { %vm398_vm9 = vmor %vm396_vm8, %vm397_vm7 }
  0xf0   : > { %v393_v7 = vsub.f32 1.0, %v392_v6 }
  0xf2   : > { %v394_v9 = vmul.f32 %v604_v5, %v393_v7 }
  0xf4   : > { %v395_v11 = vadd.f32 %v604_v5, %v394_v9 }
  0xf6   : > { %v399_v13 = vsel %vm398_vm9, %v604_v5, %v395_v11 }
  0xf7   : > { %v404_v14 = vsel %vm401_vm10, %v403_v12, %v399_v13 }
  0xf8   : > { %v406_v15 = vmul.f32 %v590_v31, %v404_v14  ;;  %v407_v16 = vmul.f32 %v592_v32, %v404_v14  ;;  %v408_v17 = vmul.f32 %v594_v34, %v404_v14  ;;  %v409_v18 = vmul.f32 %v596_v46, %v404_v14 }
  0xf9   : > { %v405_v19 = vmul.f32 %v588_v27, %v404_v14  ;;  %v410_v20 = vmul.f32 %v598_v49, %v404_v14  ;;  %v411_v23 = vmul.f32 %v600_v52, %v404_v14  ;;  %v412_v28 = vmul.f32 %v602_v55, %v404_v14 }
  0xfa   : > { %v421_v21 = vrot.slane %v406_v15, 7  ;;  %v423_v22 = vrot.slane %v407_v16, 6  ;;  %v425_v30 = vrot.slane %v408_v17, 5  ;;  %v427_v36 = vrot.slane %v409_v18, 4 }
  0xfb   : > { %v429_v38 = vrot.slane %v410_v20, 3  ;;  %v431_v40 = vrot.slane %v411_v23, 2  ;;  %v433_v42 = vrot.slane %v412_v28, 1 }
  0xfc   : > { %v422_v29 = vsel %vm363_vm0, %v421_v21, %v405_v19 }
  0xfd   : > { %v424_v35 = vsel %vm366_vm1, %v423_v22, %v422_v29 }
  0xfe   : > { %v426_v37 = vsel %vm369_vm2, %v425_v30, %v424_v35 }
  0xff   : > { %v428_v39 = vsel %vm372_vm3, %v427_v36, %v426_v37 }
 0x100   : > { %v430_v41 = vsel %vm375_vm4, %v429_v38, %v428_v39 }
 0x101   : > { %v432_v43 = vsel %vm378_vm5, %v431_v40, %v430_v41 }
 0x102   : > { %v434_v44 = vsel %vm381_vm6, %v433_v42, %v432_v43 }
 0x103   : > { %436 = vst [vmem:[%s162_s13] sm:$0xff] %v434_v44 }
 0x104   : > { %662 = shalt.err (!%p659_p7)
}
 0x105   : > { %537 = dma.vmem_to_hbm [thread:$0]  (%p772_p11), %s451_s24, 128, %s453_s25, %s438_s27  }
 0x106 PF: > { %s464_s26 = sand.u32 1, %s689_s9   ;;  %p544_p8 = pnand %p525_p9, %p776_p12 }
 0x107   : > { %s465_s6 = scalar_lea.sflag [#allocation4], %s464_s26 }
 0x108   : > { %p545_p10 = pneg %p544_p8 }
 0x10a   : > { %684 = dma.done.wait (%p545_p10), %s465_s6, 128  }
 0x10b   : > { %686 = vsyncadd (%p545_p10), %s465_s6, 4294967168  ;;  %p15_p1 = scmp.ge.s32.totalorder %s747_s15, 4   ;;  %s916_s9 = smov %s693_s10 }
 0x10c   : > { %s917_s10 = smov %s697_s11  ;;  %s918_s11 = smov %s759_s18 }
 0x10d   : > { %s919_s12 = smov %s747_s15  ;;  %17 = sbr.rel (!%p15_p1) target bundleno = 5 (0x5), region = 73 }
 0x112   :  { %471 = vsyncpa [#allocation3], 1 }
 0x113   :  { %473 = vsyncpa [#allocation3 + $0x1], 1 }
 0x114   :  { %474 = vsyncpa [#allocation4], 1 }
 0x115   :  { %476 = vsyncpa [#allocation4 + $0x1], 1 }

</bundles_post_ra>
